<compile_context>
chip_gen: v7x
topology: tpu7x:2x2x1
jax: 0.10.0
libtpu: 0.0.40
codegen_flags: <defaults>
</compile_context>

<pallas_src>
import jax
import jax.numpy as jnp
from jax import lax
from jax.experimental import pallas as pl
from jax.experimental.pallas import tpu as pltpu


def _round_up(x, m):
    return ((x + m - 1) // m) * m


def _cdiv(a, b):
    return -(-a // b)


def anomaly_kernel(a_ref, x_ref, w1_ref, w2_ref, wattr_ref,
                   attr_out_ref, adj_out_ref):
    """One grid step = one block-diagonal pack of t_blk snapshots.

    a:        [1, R, R]  bf16  block-diagonal adjacency (R = t_blk * N)
    x:        [1, R, Fp] bf16  stacked node features
    w1:       [Fp, Hp]   bf16
    w2:       [Hp, Hp]   bf16
    wattr:    [Hp, Fp]   bf16
    attr_out: [1, R, Fp] bf16
    adj_out:  [1, R, R]  bf16  Z Z^T logits (sigmoid applied by the wrapper)
    """
    a = a_ref[0]
    x = x_ref[0]
    w1 = w1_ref[...]
    w2 = w2_ref[...]
    wattr = wattr_ref[...]

    # ---- 2-layer GCN encoder (bf16 operands, f32 accumulation) ----
    ax = jnp.dot(a, x, preferred_element_type=jnp.float32)          # [R, Fp]
    h1 = jnp.maximum(
        jnp.dot(ax.astype(jnp.bfloat16), w1,
                preferred_element_type=jnp.float32),
        0.0).astype(jnp.bfloat16)                                    # [R, Hp]
    ah = jnp.dot(a, h1, preferred_element_type=jnp.float32)         # [R, Hp]
    z = jnp.dot(ah.astype(jnp.bfloat16), w2,
                preferred_element_type=jnp.float32)                  # [R, Hp]
    z_bf = z.astype(jnp.bfloat16)

    # ---- reconstruction head ----
    # Attribute decoder first: its f32 product is dead before the structure
    # logits are materialized (caps live f32 intermediates / spill pressure).
    attr_out_ref[0] = jnp.dot(
        z_bf, wattr, preferred_element_type=jnp.float32
    ).astype(jnp.bfloat16)

    # Structure decoder logits: contract over H without an explicit transpose
    # of Z.  Sigmoid is applied downstream on the de-packed diagonal blocks.
    # TODO(synk): on v5e, check the bundle dump for an inserted vxpose here;
    # if present, emit Z already as [Hp, R] from the W2 matmul instead.
    adj_out_ref[0] = lax.dot_general(
        z_bf, z_bf, (((1,), (1,)), ((), ())),
        preferred_element_type=jnp.float32
    ).astype(jnp.bfloat16)


def _choose_t_blk(T, N, Fp, Hp, budget_bytes=40 << 20):
    """Largest timestep pack that fits a v7x-safe VMEM budget, with grid>=2."""
    def est(t_blk):
        R = t_blk * N
        bf, f32 = 2, 4
        io = 2 * 2 * (R * R * bf + R * Fp * bf)          # in+out tiles, 2x buffered
        w = 2 * (Fp * Hp + Hp * Hp + Hp * Fp) * bf
        tmp = 2 * R * Fp * f32 + 4 * R * Hp * f32 + R * R * f32
        return io + w + tmp

    t_blk = max(1, T)
    while t_blk > 1 and est(t_blk) > budget_bytes:
        t_blk -= 1
    # v7x megacore: keep at least 2 grid steps so both TensorCores get work
    # (no effect on v5e/v6e which have a single TC per chip).
    if T >= 2 and _cdiv(T, t_blk) < 2:
        t_blk = _cdiv(T, 2)
    return t_blk


def anomaly_detector_forward(hist_adj, hist_feats, hist_masks, params,
                             *, t_blk=None, vmem_limit_bytes=48 << 20):
    """hist_adj: [T,N,N], hist_feats: [T,N,F], hist_masks: [T,N].

    Returns (pred_attribute, pred_adj) stacked over timesteps as [T,N,F] and
    [T,N,N] float32; index [t] recovers the per-snapshot matrices returned by
    the PyTorch forward().

    Note: in the PyTorch module `mask_list[t]` only feeds the head's *loss*;
    the prediction path does not depend on it, so `hist_masks` is accepted for
    API parity but ignored here.
    """
    del hist_masks  # loss-only input; not needed for the prediction path.
    T, N, _ = hist_adj.shape
    F_in = hist_feats.shape[-1]
    H = params["w1"].shape[-1]

    # Lane dims: pad feature/hidden to 128.  Deliberately NOT 256 on the
    # 256-wide MXU generations: zero-FLOP padding costs more than a
    # half-filled contraction; occupancy comes from the packed rows instead.
    Fp = _round_up(F_in, 128)
    Hp = _round_up(H, 128)

    if t_blk is None:
        t_blk = _choose_t_blk(T, N, Fp, Hp)
    G = _cdiv(T, t_blk)          # grid steps
    Tp = G * t_blk               # zero-padded timesteps are sliced off below
    R = t_blk * N                # packed rows per grid step

    # ---- wrapper-side repack: block-diagonal adjacency + flattened features ----
    adj_pad = jnp.pad(hist_adj, ((0, Tp - T), (0, 0), (0, 0))
                      ).astype(jnp.bfloat16).reshape(G, t_blk, N, N)
    eye = jnp.eye(t_blk, dtype=jnp.bfloat16)
    adj_blk = (adj_pad[:, :, :, None, :] * eye[None, :, None, :, None]
               ).reshape(G, R, R)

    feat_blk = jnp.pad(hist_feats, ((0, Tp - T), (0, 0), (0, Fp - F_in))
                       ).astype(jnp.bfloat16).reshape(G, R, Fp)

    w1_p = jnp.pad(params["w1"], ((0, Fp - F_in), (0, Hp - H))).astype(jnp.bfloat16)
    w2_p = jnp.pad(params["w2"], ((0, Hp - H), (0, Hp - H))).astype(jnp.bfloat16)
    wattr_p = jnp.pad(params["w_attr"], ((0, Hp - H), (0, Fp - F_in))
                      ).astype(jnp.bfloat16)

    # Advisory cost estimate so XLA schedules the surrounding pad/slice ops
    # against the custom call.
    flops = 2 * G * (R * R * Fp + R * Fp * Hp + R * R * Hp
                     + R * Hp * Hp + R * Hp * Fp + R * Hp * R)
    in_bytes = 2 * (G * R * R + G * R * Fp + Fp * Hp + Hp * Hp + Hp * Fp)
    out_bytes = 2 * (G * R * Fp + G * R * R)
    cost = pl.CostEstimate(flops=int(flops), transcendentals=0,
                           bytes_accessed=int(in_bytes + out_bytes))

    attr_blk, adj_logits_blk = pl.pallas_call(
        anomaly_kernel,
        out_shape=(
            jax.ShapeDtypeStruct((G, R, Fp), jnp.bfloat16),
            jax.ShapeDtypeStruct((G, R, R), jnp.bfloat16),
        ),
        grid_spec=pltpu.PrefetchScalarGridSpec(
            num_scalar_prefetch=0,
            grid=(G,),
            in_specs=[
                pl.BlockSpec((1, R, R), lambda g: (g, 0, 0)),
                pl.BlockSpec((1, R, Fp), lambda g: (g, 0, 0)),
                pl.BlockSpec((Fp, Hp), lambda g: (0, 0)),
                pl.BlockSpec((Hp, Hp), lambda g: (0, 0)),
                pl.BlockSpec((Hp, Fp), lambda g: (0, 0)),
            ],
            out_specs=[
                pl.BlockSpec((1, R, Fp), lambda g: (g, 0, 0)),
                pl.BlockSpec((1, R, R), lambda g: (g, 0, 0)),
            ],
        ),
        compiler_params=pltpu.CompilerParams(
            dimension_semantics=("parallel",),
            vmem_limit_bytes=vmem_limit_bytes,
        ),
        cost_estimate=cost,
    )(adj_blk, feat_blk, w1_p, w2_p, wattr_p)

    # ---- un-pack back to the module's native per-timestep shapes ----
    pred_attribute = attr_blk.reshape(Tp, N, Fp)[:T, :, :F_in].astype(jnp.float32)

    # Diagonal N x N blocks of the packed Z Z^T logits, then the head's sigmoid
    # (done in f32 on the de-packed, unpadded blocks).
    logits5 = adj_logits_blk.reshape(G, t_blk, N, t_blk, N)
    diag = jnp.diagonal(logits5, axis1=1, axis2=3)          # [G, N, N, t_blk]
    logits = jnp.moveaxis(diag, -1, 1).reshape(Tp, N, N)[:T]
    pred_adj = jax.nn.sigmoid(logits.astype(jnp.float32))

    return pred_attribute, pred_adj


def init_params(key, f_in, hidden):
    k1, k2, k3 = jax.random.split(key, 3)

    def glorot(k, shape):
        scale = jnp.sqrt(6.0 / (shape[0] + shape[1]))
        return jax.random.uniform(k, shape, jnp.float32, -scale, scale)

    return {
        "w1": glorot(k1, (f_in, hidden)),
        "w2": glorot(k2, (hidden, hidden)),
        "w_attr": glorot(k3, (hidden, f_in)),
    }


def _reference_forward(hist_adj, hist_feats, params):
    """Pure-JAX f32 reference of the same forward pass (for validation)."""
    def step(a, x):
        h1 = jnp.maximum((a @ x) @ params["w1"], 0.0)
        z = (a @ h1) @ params["w2"]
        return z @ params["w_attr"], jax.nn.sigmoid(z @ z.T)
    return jax.vmap(step)(hist_adj, hist_feats)


if __name__ == "__main__":
    T, N, F_IN, HIDDEN = 8, 16, 16, 32
    key = jax.random.PRNGKey(0)
    k_adj, k_feat, k_mask, k_param = jax.random.split(key, 4)

    # random symmetric adjacency with self-loops, symmetrically normalized
    raw = (jax.random.uniform(k_adj, (T, N, N)) > 0.7).astype(jnp.float32)
    adj = jnp.clip(raw + jnp.swapaxes(raw, 1, 2), 0.0, 1.0)
    adj = adj + jnp.eye(N, dtype=jnp.float32)[None]
    deg = jnp.sum(adj, axis=-1)                          # [T, N]
    d_inv_sqrt = 1.0 / jnp.sqrt(deg)
    adj = adj * d_inv_sqrt[:, :, None] * d_inv_sqrt[:, None, :]

    feats = jax.random.normal(k_feat, (T, N, F_IN), jnp.float32)
    masks = (jax.random.uniform(k_mask, (T, N)) > 0.5).astype(jnp.float32)

    params = init_params(k_param, F_IN, HIDDEN)

    pred_attr, pred_adj = anomaly_detector_forward(adj, feats, masks, params)
    jax.block_until_ready((pred_attr, pred_adj))

    assert pred_attr.shape == (T, N, F_IN)
    assert pred_adj.shape == (T, N, N)

    # Validate against the pure-JAX f32 reference (bf16 operand storage and
    # bf16 output/logit storage in the kernel => loose tolerance).
    ref_attr, ref_adj = _reference_forward(adj, feats, params)
    assert jnp.allclose(pred_attr, ref_attr, atol=1e-1, rtol=1e-1)
    assert jnp.allclose(pred_adj, ref_adj, atol=5e-2, rtol=5e-2)

    print("KERNEL_OK")
</pallas_src>

<mosaic_0001>
module attributes {stable_mosaic.version = 11 : i64} {
  func.func @anomaly_kernel(%arg0: i32, %arg1: memref<1x64x64xbf16, #tpu.memory_space<vmem>>, %arg2: memref<1x64x128xbf16, #tpu.memory_space<vmem>>, %arg3: memref<128x128xbf16, #tpu.memory_space<vmem>>, %arg4: memref<128x128xbf16, #tpu.memory_space<vmem>>, %arg5: memref<128x128xbf16, #tpu.memory_space<vmem>>, %arg6: memref<1x64x128xbf16, #tpu.memory_space<vmem>>, %arg7: memref<1x64x64xbf16, #tpu.memory_space<vmem>>) attributes {dimension_semantics = [#tpu.dimension_semantics<parallel>], iteration_bounds = array<i64: 2>, scalar_prefetch = 0 : i64, scratch_operands = 0 : i64, tpu.core_type = #tpu.core_type<tc>, window_params = [{transform_indices = @transform_0, window_bounds = array<i64: 1, 64, 64>}, {transform_indices = @transform_1, window_bounds = array<i64: 1, 64, 128>}, {pipeline_mode = #tpu.pipeline_mode<synchronous>, transform_indices = @transform_2, window_bounds = array<i64: 128, 128>}, {pipeline_mode = #tpu.pipeline_mode<synchronous>, transform_indices = @transform_3, window_bounds = array<i64: 128, 128>}, {pipeline_mode = #tpu.pipeline_mode<synchronous>, transform_indices = @transform_4, window_bounds = array<i64: 128, 128>}, {transform_indices = @transform_5, window_bounds = array<i64: 1, 64, 128>}, {transform_indices = @transform_6, window_bounds = array<i64: 1, 64, 64>}]} {
    %c0 = arith.constant 0 : index
    %c0_0 = arith.constant 0 : index
    %c0_1 = arith.constant 0 : index
    %0 = vector.load %arg1[%c0, %c0_0, %c0_1] : memref<1x64x64xbf16, #tpu.memory_space<vmem>>, vector<1x64x64xbf16>
    %1 = vector.shape_cast %0 : vector<1x64x64xbf16> to vector<64x64xbf16>
    %c0_2 = arith.constant 0 : index
    %c0_3 = arith.constant 0 : index
    %c0_4 = arith.constant 0 : index
    %2 = vector.load %arg2[%c0_2, %c0_3, %c0_4] : memref<1x64x128xbf16, #tpu.memory_space<vmem>>, vector<1x64x128xbf16>
    %3 = vector.shape_cast %2 : vector<1x64x128xbf16> to vector<64x128xbf16>
    %c0_5 = arith.constant 0 : index
    %c0_6 = arith.constant 0 : index
    %4 = vector.load %arg3[%c0_5, %c0_6] : memref<128x128xbf16, #tpu.memory_space<vmem>>, vector<128x128xbf16>
    %c0_7 = arith.constant 0 : index
    %c0_8 = arith.constant 0 : index
    %5 = vector.load %arg4[%c0_7, %c0_8] : memref<128x128xbf16, #tpu.memory_space<vmem>>, vector<128x128xbf16>
    %c0_9 = arith.constant 0 : index
    %c0_10 = arith.constant 0 : index
    %6 = vector.load %arg5[%c0_9, %c0_10] : memref<128x128xbf16, #tpu.memory_space<vmem>>, vector<128x128xbf16>
    %cst = arith.constant dense<0.000000e+00> : vector<64x128xf32>
    %7 = tpu.matmul %1, %3, %cst {dimension_numbers = #tpu.dot_dimension_numbers<[1], [0], [0], [1], [0, 0, 1, 1], [], []>} : vector<64x64xbf16>, vector<64x128xbf16>, vector<64x128xf32> -> vector<64x128xf32>
    %8 = arith.truncf %7 : vector<64x128xf32> to vector<64x128xbf16>
    %cst_11 = arith.constant dense<0.000000e+00> : vector<64x128xf32>
    %9 = tpu.matmul %8, %4, %cst_11 {dimension_numbers = #tpu.dot_dimension_numbers<[1], [0], [0], [1], [0, 0, 1, 1], [], []>} : vector<64x128xbf16>, vector<128x128xbf16>, vector<64x128xf32> -> vector<64x128xf32>
    %cst_12 = arith.constant 0.000000e+00 : f32
    %10 = vector.broadcast %cst_12 : f32 to vector<64x128xf32>
    %11 = arith.maximumf %9, %10 : vector<64x128xf32>
    %12 = arith.truncf %11 : vector<64x128xf32> to vector<64x128xbf16>
    %cst_13 = arith.constant dense<0.000000e+00> : vector<64x128xf32>
    %13 = tpu.matmul %1, %12, %cst_13 {dimension_numbers = #tpu.dot_dimension_numbers<[1], [0], [0], [1], [0, 0, 1, 1], [], []>} : vector<64x64xbf16>, vector<64x128xbf16>, vector<64x128xf32> -> vector<64x128xf32>
    %14 = arith.truncf %13 : vector<64x128xf32> to vector<64x128xbf16>
    %cst_14 = arith.constant dense<0.000000e+00> : vector<64x128xf32>
    %15 = tpu.matmul %14, %5, %cst_14 {dimension_numbers = #tpu.dot_dimension_numbers<[1], [0], [0], [1], [0, 0, 1, 1], [], []>} : vector<64x128xbf16>, vector<128x128xbf16>, vector<64x128xf32> -> vector<64x128xf32>
    %16 = arith.truncf %15 : vector<64x128xf32> to vector<64x128xbf16>
    %cst_15 = arith.constant dense<0.000000e+00> : vector<64x128xf32>
    %17 = tpu.matmul %16, %6, %cst_15 {dimension_numbers = #tpu.dot_dimension_numbers<[1], [0], [0], [1], [0, 0, 1, 1], [], []>} : vector<64x128xbf16>, vector<128x128xbf16>, vector<64x128xf32> -> vector<64x128xf32>
    %18 = arith.truncf %17 : vector<64x128xf32> to vector<64x128xbf16>
    %c0_16 = arith.constant 0 : index
    %c0_17 = arith.constant 0 : index
    %c0_18 = arith.constant 0 : index
    %19 = vector.load %arg6[%c0_16, %c0_17, %c0_18] : memref<1x64x128xbf16, #tpu.memory_space<vmem>>, vector<1x64x128xbf16>
    %20 = vector.shape_cast %19 : vector<1x64x128xbf16> to vector<64x128xbf16>
    %21 = vector.shape_cast %18 : vector<64x128xbf16> to vector<1x64x128xbf16>
    tpu.vector_store %arg6[%c0_16, %c0_17, %c0_18], %21 {strides = array<i32>} : memref<1x64x128xbf16, #tpu.memory_space<vmem>>, vector<1x64x128xbf16>,
    %cst_19 = arith.constant dense<0.000000e+00> : vector<64x64xf32>
    %22 = tpu.matmul %16, %16, %cst_19 {dimension_numbers = #tpu.dot_dimension_numbers<[1], [1], [0], [0], [0, 0, 1, 0], [], []>} : vector<64x128xbf16>, vector<64x128xbf16>, vector<64x64xf32> -> vector<64x64xf32>
    %23 = arith.truncf %22 : vector<64x64xf32> to vector<64x64xbf16>
    %c0_20 = arith.constant 0 : index
    %c0_21 = arith.constant 0 : index
    %c0_22 = arith.constant 0 : index
    %24 = vector.load %arg7[%c0_20, %c0_21, %c0_22] : memref<1x64x64xbf16, #tpu.memory_space<vmem>>, vector<1x64x64xbf16>
    %25 = vector.shape_cast %24 : vector<1x64x64xbf16> to vector<64x64xbf16>
    %26 = vector.shape_cast %23 : vector<64x64xbf16> to vector<1x64x64xbf16>
    tpu.vector_store %arg7[%c0_20, %c0_21, %c0_22], %26 {strides = array<i32>} : memref<1x64x64xbf16, #tpu.memory_space<vmem>>, vector<1x64x64xbf16>,
    return
  }
  func.func @transform_0(%arg0: i32) -> (i32, i32, i32) {
    %c0_i32 = arith.constant 0 : i32
    %c0_i32_0 = arith.constant 0 : i32
    %c0_i32_1 = arith.constant 0 : i32
    return %arg0, %c0_i32, %c0_i32_0 : i32, i32, i32
  }
  func.func @transform_1(%arg0: i32) -> (i32, i32, i32) {
    %c0_i32 = arith.constant 0 : i32
    %c0_i32_0 = arith.constant 0 : i32
    %c0_i32_1 = arith.constant 0 : i32
    return %arg0, %c0_i32, %c0_i32_0 : i32, i32, i32
  }
  func.func @transform_2(%arg0: i32) -> (i32, i32) {
    %c0_i32 = arith.constant 0 : i32
    %c0_i32_0 = arith.constant 0 : i32
    %c0_i32_1 = arith.constant 0 : i32
    return %c0_i32, %c0_i32_0 : i32, i32
  }
  func.func @transform_3(%arg0: i32) -> (i32, i32) {
    %c0_i32 = arith.constant 0 : i32
    %c0_i32_0 = arith.constant 0 : i32
    %c0_i32_1 = arith.constant 0 : i32
    return %c0_i32, %c0_i32_0 : i32, i32
  }
  func.func @transform_4(%arg0: i32) -> (i32, i32) {
    %c0_i32 = arith.constant 0 : i32
    %c0_i32_0 = arith.constant 0 : i32
    %c0_i32_1 = arith.constant 0 : i32
    return %c0_i32, %c0_i32_0 : i32, i32
  }
  func.func @transform_5(%arg0: i32) -> (i32, i32, i32) {
    %c0_i32 = arith.constant 0 : i32
    %c0_i32_0 = arith.constant 0 : i32
    %c0_i32_1 = arith.constant 0 : i32
    return %arg0, %c0_i32, %c0_i32_0 : i32, i32, i32
  }
  func.func @transform_6(%arg0: i32) -> (i32, i32, i32) {
    %c0_i32 = arith.constant 0 : i32
    %c0_i32_0 = arith.constant 0 : i32
    %c0_i32_1 = arith.constant 0 : i32
    return %arg0, %c0_i32, %c0_i32_0 : i32, i32, i32
  }
}

</mosaic_0001>

<bundles_post_ra>
// kernel: tpu_custom_call.1
= control target key start
LH: loop header
LB: loop body
LE: loop exit
PB: predicated region body
PF: predicated region fallthrough
CT: control target
= control target key end

     0   :  { %s2446_s0 = inlined_call_operand.hbm [shape: bf16[2,64,64], index: 0, kind: input, shape index: {}]   ;;  %s2447_s1 = inlined_call_operand.hbm [shape: bf16[2,64,128], index: 1, kind: input, shape index: {}]   ;;  %s2448_s2 = inlined_call_operand.hbm [shape: bf16[128,128], index: 2, kind: input, shape index: {}]   ;;  %s2449_s3 = inlined_call_operand.hbm [shape: bf16[128,128], index: 3, kind: input, shape index: {}]   ;;  %s2450_s4 = inlined_call_operand.hbm [shape: bf16[128,128], index: 4, kind: input, shape index: {}]   ;;  %s2451_s5 = inlined_call_operand.hbm [shape: bf16[2,64,128], index: 5, kind: output, shape index: {0}]   ;;  %s2452_s6 = inlined_call_operand.hbm [shape: bf16[2,64,64], index: 6, kind: output, shape index: {1}]  }
   0x1   :  { %2460 = sst [smem:[#allocation21_spill]] %s2446_s0 }
   0x2   :  { %2461 = sst [smem:[#allocation22_spill]] %s2448_s2 }
   0x3   :  { %2462 = sst [smem:[#allocation23_spill]] %s2449_s3 }
   0x4   :  { %2463 = sst [smem:[#allocation24_spill]] %s2450_s4 }
   0x5   :  { %12 = vsyncpa [#allocation3], 0 }
   0x6   :  { %14 = vsyncpa [#allocation3 + $0x1], 0 }
   0x7   :  { %15 = vsyncpa [#allocation6], 0 }
   0x8   :  { %17 = vsyncpa [#allocation6 + $0x1], 0 }
   0x9   :  { %18 = vsyncpa [#allocation9], 0 }
   0xa   :  { %19 = vsyncpa [#allocation4], 0 }
   0xb   :  { %21 = vsyncpa [#allocation4 + $0x1], 0 }
   0xc   :  { %22 = vsyncpa [#allocation13], 0 }
   0xd   :  { %24 = vsyncpa [#allocation13 + $0x1], 0  ;;  %s2048_s21 = smov 0   ;;  %s2050_s22 = smov 0  }
   0xe   :  { %s2052_s23 = smov 0   ;;  %s2054_s24 = smov 0  }
   0xf LB: > { %s2069_s25 = sadd.s32 4294967295, %s2000_s24   ;;  %s1316_s26 = sadd.s32 4294967294, %s2000_s24   ;;  %s2000_s24 = sphi %s2054_s24, %s2491_s24   ;;  %s1996_s23 = sphi %s2052_s23, %s2490_s23   ;;  %s1992_s22 = sphi %s2050_s22, %s2489_s22   ;;  %s1988_s21 = sphi %s2048_s21, %s2488_s21  }
  0x10   : > { %p50_p0 = scmp.ne.s32.totalorder %s1992_s22, %s1988_s21  ;;  %p2453_p1 = scmp.eq.s32.totalorder %s2069_s25, 0 }
  0x11   : > { %p169_p3 = scmp.eq.s32.totalorder %s1316_s26, 1  ;;  %p1317_p5 = scmp.ge.s32.totalorder %s2000_s24, 1 }
  0x12   : > { %p2078_p4 = por %p2453_p1, %p50_p0  ;;  %p202_p7 = scmp.lt.s32.totalorder %s2000_s24, 3 }
  0x13   : > { %p2083_p6 = por %p169_p3, %p50_p0  ;;  %s2002_s30 = smov [#allocation7]  }
  0x14   : > { %s2464_s27 = scalar_select %p2078_p4, 1, 0 }
  0x15   : > { %s2465_s28 = scalar_select %p2083_p6, 1, 0 }
  0x16   : > { %p2088_p8 = pnand %p1317_p5, %p202_p7  ;;  %s214_s7 = sshll.u32 %s2002_s30, 4  ;;  %s2092_s7 = int_to_ptr.vmem [resolvable:$true] %s214_s7 }
  0x17   : > { %s2003_s9 = smov [#allocation8]   ;;  %s2004_s11 = smov [#allocation10]  }
  0x18   : > { %s2466_s29 = scalar_select %p2088_p8, 1, 0 }
  0x19   : > { %p1643_p9 = pneg %p2088_p8  ;;  %s227_s10 = sshll.u32 %s2003_s9, 4  ;;  %s2103_s10 = int_to_ptr.vmem [resolvable:$true] %s227_s10 }
  0x1a   : > { %s2105_s12 = sshll.u32 %s2004_s11, 4  ;;  %s2468_s2 = sld [smem:[#allocation22_spill]]  ;;  %s241_s12 = int_to_ptr.vmem [resolvable:$true] %s2105_s12 }
  0x1b   : > { %p2099_p11 = pnand %p1643_p9, %p2453_p1 }
  0x1d   : > { %p2115_p13 = pneg %p2099_p11 }
  0x20   : > { %s1746_s15 = scalar_lea.hbm %s2468_s2, 1024 }
  0x21   : > { %p1747_p12 = scmp.ne.s32.totalorder %s2468_s2, %s1746_s15  ;;  %p1753_p5 = scmp.lt.u32.totalorder %s1746_s15, %s2468_s2 }
  0x23   : > { %p1749_p0 = pnand %p2115_p13, %p1747_p12 }
  0x25   : > { %p1750_p3 = pneg %p1749_p0 }
  0x27   : > { %p1755_p7 = pnand %p1753_p5, %p1750_p3 }
  0x29   : > { %1758 = shalt.err (!%p1755_p7)
}
  0x2a   : > { %s1759_s26 = scalar_lea.vmem %s2092_s7, 1024  ;;  %p1767_p2 = scmp.lt.s32.totalorder %s2092_s7, %s2092_s7 }
  0x2b   : > { %p1760_p9 = scmp.ne.s32.totalorder %s2092_s7, %s1759_s26  ;;  %p1768_p6 = scmp.lt.s32.totalorder %s1759_s26, %s1759_s26 }
  0x2d   : > { %p1762_p10 = pnand %p1760_p9, %p2115_p13  ;;  %p1769_p12 = por %p1768_p6, %p1767_p2 }
  0x2f   : > { %p1763_p1 = pneg %p1762_p10 }
  0x31   : > { %p1770_p0 = pnand %p1769_p12, %p1763_p1 }
  0x33   : > { %1773 = shalt.err (!%p1770_p0)
}
  0x34   : > { %s2456_s30 = smov 64   ;;  %s2458_s9 = smov 4  }
  0x35   : > { %1646 = dma.hbm_to_vmem [thread:$0]  (!%p2099_p11), %s2468_s2, 1024, %s2092_s7, [#allocation6], %s2456_s30, %s2456_s30, %s2458_s9  }
  0x36   : > { %s2470_s3 = sld [smem:[#allocation23_spill]] }
  0x3c   : > { %s1774_s16 = scalar_lea.hbm %s2470_s3, 1024 }
  0x3d   : > { %p1775_p1 = scmp.ne.s32.totalorder %s2470_s3, %s1774_s16  ;;  %p1781_p10 = scmp.lt.u32.totalorder %s1774_s16, %s2470_s3 }
  0x3f   : > { %p1777_p2 = pnand %p1775_p1, %p2115_p13 }
  0x41   : > { %p1778_p6 = pneg %p1777_p2 }
  0x43   : > { %p1783_p3 = pnand %p1781_p10, %p1778_p6 }
  0x45   : > { %1786 = shalt.err (!%p1783_p3)
}
  0x46   : > { %s1787_s7 = scalar_lea.vmem %s2103_s10, 1024  ;;  %p1795_p12 = scmp.lt.s32.totalorder %s2103_s10, %s2103_s10 }
  0x47   : > { %p1788_p5 = scmp.ne.s32.totalorder %s2103_s10, %s1787_s7  ;;  %p1796_p0 = scmp.lt.s32.totalorder %s1787_s7, %s1787_s7 }
  0x49   : > { %p1790_p7 = pnand %p1788_p5, %p2115_p13  ;;  %p1797_p1 = por %p1796_p0, %p1795_p12 }
  0x4b   : > { %p1791_p9 = pneg %p1790_p7 }
  0x4d   : > { %p1798_p2 = pnand %p1797_p1, %p1791_p9 }
  0x4f   : > { %1801 = shalt.err (!%p1798_p2)
}
  0x50   : > { %1649 = dma.hbm_to_vmem [thread:$0]  (!%p2099_p11), %s2470_s3, 1024, %s2103_s10, [#allocation9], %s2456_s30, %s2456_s30, %s2458_s9  }
  0x51   : > { %s2471_s4 = sld [smem:[#allocation24_spill]] }
  0x57   : > { %s1802_s16 = scalar_lea.hbm %s2471_s4, 1024 }
  0x58   : > { %p1803_p6 = scmp.ne.s32.totalorder %s2471_s4, %s1802_s16  ;;  %p1809_p5 = scmp.lt.u32.totalorder %s1802_s16, %s2471_s4 }
  0x5a   : > { %p1805_p10 = pnand %p1803_p6, %p2115_p13 }
  0x5c   : > { %p1806_p3 = pneg %p1805_p10 }
  0x5e   : > { %p1811_p7 = pnand %p1809_p5, %p1806_p3 }
  0x60   : > { %1814 = shalt.err (!%p1811_p7)
}
  0x61   : > { %s1815_s7 = scalar_lea.vmem %s241_s12, 1024  ;;  %p1823_p1 = scmp.lt.s32.totalorder %s241_s12, %s241_s12 }
  0x62   : > { %p1816_p9 = scmp.ne.s32.totalorder %s241_s12, %s1815_s7  ;;  %p1824_p2 = scmp.lt.s32.totalorder %s1815_s7, %s1815_s7 }
  0x64   : > { %p1818_p12 = pnand %p1816_p9, %p2115_p13  ;;  %p1825_p4 = por %p1824_p2, %p1823_p1 }
  0x66   : > { %p1819_p0 = pneg %p1818_p12 }
  0x68   : > { %p1826_p8 = pnand %p1825_p4, %p1819_p0 }
  0x6a   : > { %1829 = shalt.err (!%p1826_p8)
}
  0x6b   : > { %1652 = dma.hbm_to_vmem [thread:$0]  (!%p2099_p11), %s2471_s4, 1024, %s241_s12, [#allocation9], %s2456_s30, %s2456_s30, %s2458_s9  }
  0x6c   : > { %s2188_s18 = sadd.s32 1, %s2000_s24   ;;  %s37_s13 = sadd.s32 1, %s1996_s23 }
  0x6d   : > { %s34_s8 = ssub.s32 %s2000_s24, %s2188_s18  ;;  %p44_p8 = scmp.ne.s32.totalorder %s1996_s23, %s1992_s22 }
  0x6e   : > { %p35_p4 = scmp.eq.s32.totalorder %s34_s8, 0  ;;  %p45_p13 = scmp.eq.s32.totalorder %s2000_s24, 0 }
  0x6f   : > { %p1670_p6 = scmp.lt.s32.totalorder %s2000_s24, 2  ;;  %p2473_p3 = scmp.eq.s32.totalorder %s2069_s25, 1 }
  0x70   : > { %s2198_s14 = scalar_select %p35_p4, %s1996_s23, %s37_s13  }
  0x71   : > { %p46_p10 = por %p45_p13, %p44_p8  ;;  %p2202_p5 = por %p2473_p3, %p44_p8 }
  0x72   : > { %2472 = sst [smem:[#allocation20_spill]] %s2198_s14  ;;  %s254_s16 = sand.u32 1, %s1996_s23  }
  0x73   : > { %s1400_s17 = sshll.u32 %s2000_s24, 9  ;;  %s2208_s12 = sshll.u32 %s254_s16, 5 }
  0x74   : > { %s2475_s0 = sld [smem:[#allocation21_spill]]  ;;  %s258_s7 = scalar_lea.vmem [#allocation2], %s2208_s12 }
  0x75   : > { %s265_s10 = sshll.u32 %s258_s7, 4  ;;  %p2216_p11 = pnand %p1670_p6, %p46_p10  ;;  %s2220_s10 = int_to_ptr.vmem [resolvable:$true] %s265_s10 }
  0x76   : > { %s2225_s19 = scalar_lea.hbm %s2447_s1, %s1400_s17  ;;  %s2227_s20 = scalar_lea.sflag [#allocation3], %s254_s16 }
  0x77   : > { %p1832_p9 = pneg %p2216_p11 }
  0x7a   : > { %s2213_s26 = scalar_lea.hbm %s2475_s0, %s1400_s17  ;;  %s1835_s2 = scalar_lea.hbm %s2475_s0, 1024 }
  0x7b   : > { %s1830_s30 = scalar_lea.hbm %s2213_s26, 512  ;;  %p1836_p1 = scmp.lt.u32.totalorder %s2213_s26, %s2475_s0 }
  0x7c   : > { %p1831_p7 = scmp.ne.s32.totalorder %s2213_s26, %s1830_s30  ;;  %p1837_p2 = scmp.lt.u32.totalorder %s1835_s2, %s1830_s30 }
  0x7d   : > { %p1839_p8 = scmp.lt.u32.totalorder %s1830_s30, %s2213_s26 }
  0x7e   : > { %p1833_p12 = pnand %p1832_p9, %p1831_p7  ;;  %p1838_p4 = por %p1837_p2, %p1836_p1 }
  0x80   : > { %p1834_p0 = pneg %p1833_p12  ;;  %p1840_p13 = por %p1839_p8, %p1838_p4 }
  0x82   : > { %p1841_p6 = pnand %p1840_p13, %p1834_p0 }
  0x84   : > { %1844 = shalt.err (!%p1841_p6)
}
  0x85   : > { %s1845_s16 = scalar_lea.vmem %s2220_s10, 512  ;;  %s2007_s9 = smov [#allocation2]  }
  0x86   : > { %p1846_p10 = scmp.ne.s32.totalorder %s2220_s10, %s1845_s16  ;;  %s1850_s17 = sshll.u32 %s2007_s9, 4  ;;  %s1851_s17 = int_to_ptr.vmem [resolvable:$false] %s1850_s17 }
  0x87   : > { %s1852_s3 = scalar_lea.vmem %s1851_s17, 1024  ;;  %p1853_p12 = scmp.lt.s32.totalorder %s2220_s10, %s1851_s17 }
  0x88   : > { %p1848_p3 = pnand %p1846_p10, %p1832_p9  ;;  %p1854_p1 = scmp.lt.s32.totalorder %s1852_s3, %s1845_s16 }
  0x8a   : > { %p1849_p7 = pneg %p1848_p3  ;;  %p1855_p2 = por %p1854_p1, %p1853_p12 }
  0x8c   : > { %p1856_p4 = pnand %p1855_p2, %p1849_p7 }
  0x8e   : > { %1859 = shalt.err (!%p1856_p4)
}
  0x8f   : > { %s2477_s2 = smov 4   ;;  %s2478_s4 = smov 64  }
  0x90   : > { %1656 = dma.hbm_to_vmem [thread:$0]  (!%p2216_p11), %s2213_s26, 512, %s2220_s10, %s2227_s20, %s2478_s4, %s2478_s4, %s2477_s2  }
  0x91   : > { %s279_s30 = scalar_lea.vmem [#allocation5], %s2208_s12  ;;  %s275_s13 = sand.u32 1, %s2000_s24  }
  0x92   : > { %s286_s8 = sshll.u32 %s279_s30, 4  ;;  %s2262_s7 = scalar_lea.sflag [#allocation6], %s275_s13  ;;  %s2260_s8 = int_to_ptr.vmem [resolvable:$true] %s286_s8 }
  0x93   : > { %s1860_s16 = scalar_lea.hbm %s2225_s19, 512  ;;  %s1865_s3 = scalar_lea.hbm %s2447_s1, 1024 }
  0x94   : > { %p1861_p0 = scmp.ne.s32.totalorder %s2225_s19, %s1860_s16  ;;  %p1866_p6 = scmp.lt.u32.totalorder %s2225_s19, %s2447_s1 }
  0x95   : > { %p1867_p10 = scmp.lt.u32.totalorder %s1865_s3, %s1860_s16  ;;  %p1869_p7 = scmp.lt.u32.totalorder %s1860_s16, %s2225_s19 }
  0x96   : > { %p1863_p8 = pnand %p1861_p0, %p1832_p9 }
  0x97   : > { %p1868_p3 = por %p1867_p10, %p1866_p6 }
  0x98   : > { %p1864_p13 = pneg %p1863_p8 }
  0x99   : > { %p1870_p12 = por %p1869_p7, %p1868_p3 }
  0x9b   : > { %p1871_p1 = pnand %p1870_p12, %p1864_p13 }
  0x9d   : > { %1874 = shalt.err (!%p1871_p1)
}
  0x9e   : > { %s1875_s12 = scalar_lea.vmem %s2260_s8, 512  ;;  %s2008_s26 = smov [#allocation5]  }
  0x9f   : > { %p1876_p2 = scmp.ne.s32.totalorder %s2260_s8, %s1875_s12  ;;  %s1880_s10 = sshll.u32 %s2008_s26, 4  ;;  %s1881_s10 = int_to_ptr.vmem [resolvable:$false] %s1880_s10 }
  0xa0   : > { %s1882_s0 = scalar_lea.vmem %s1881_s10, 1024  ;;  %p1883_p8 = scmp.lt.s32.totalorder %s2260_s8, %s1881_s10 }
  0xa1   : > { %p1878_p4 = pnand %p1876_p2, %p1832_p9  ;;  %p1884_p6 = scmp.lt.s32.totalorder %s1882_s0, %s1875_s12 }
  0xa3   : > { %p1879_p0 = pneg %p1878_p4  ;;  %p1885_p10 = por %p1884_p6, %p1883_p8 }
  0xa5   : > { %p1886_p3 = pnand %p1885_p10, %p1879_p0 }
  0xa7   : > { %1889 = shalt.err (!%p1886_p3)
}
  0xa8   : > { %1659 = dma.hbm_to_vmem [thread:$0]  (!%p2216_p11), %s2225_s19, 512, %s2260_s8, %s2262_s7, %s2478_s4, %s2478_s4, %s2477_s2  }
  0xa9   : > { %p2479_p9 = scmp.ne.s32.totalorder %s2466_s29, 0 }
  0xaa   : > { %s2294_s14 = sand.u32 (!%p2479_p9), 1, %s1992_s22   ;;  %p2480_p13 = scmp.ne.s32.totalorder (!%p2479_p9), %s2464_s27, 0 }
  0xab   : > { %298 = sbr.rel (%p2479_p9) target bundleno = 1366 (0x556), region = 40  ;;  %s2297_s20 = sshll.u32 (!%p2479_p9), %s2294_s14, 5 }
  0xac   : > { %s301_s11 = scalar_lea.sflag (!%p2479_p9), [#allocation3], %s2294_s14  ;;  %s2301_s30 = scalar_lea.vmem (!%p2479_p9), [#allocation2], %s2297_s20 }
  0xb2   : > { %1963 = dma.done.wait (%p2480_p13), %s301_s11, 512  }
  0xb3   : > { %1965 = vsyncadd (%p2480_p13), %s301_s11, 4294966784  ;;  %s309_s29 = sand.u32 1, %s2069_s25   ;;  %s313_s2 = scalar_lea.vmem [#allocation5], %s2297_s20 }
  0xb4   : > { %s310_s19 = scalar_lea.sflag [#allocation6], %s309_s29 }
  0xb5   : > { %1967 = dma.done.wait (%p2480_p13), %s310_s19, 512  }
  0xb6   : > { %1969 = vsyncadd (%p2480_p13), %s310_s19, 4294966784  ;;  %p2481_p11 = scmp.eq.s32.totalorder %s2069_s25, 0 }
  0xb8   : > { %1971 = dma.done.wait (%p2481_p11), [#allocation6], 1024   ;;  %p2482_p7 = pmov %p2481_p11 }
  0xba   : > { %1973 = vsyncadd (%p2482_p7), [#allocation6], 4294966272  ;;  %p2483_p12 = pmov %p2482_p7 }
  0xbb   : > { %p2484_p1 = pmov %p2482_p7 }
  0xbc   : > { %1975 = dma.done.wait (%p2483_p12), [#allocation9], 2048  }
  0xbd   : > { %1977 = vsyncadd (%p2484_p1), [#allocation9], 4294965248  ;;  %v1714_v0 = vld [vmem:[%s313_s2] sm:$0xff]   ;;  %v1715_v1 = vld [vmem:[%s313_s2 + $0x8] sm:$0xff]   ;;  %vm473_vm0 = vcmask 523264   ;;  %s356_s27 = scalar_lea.vmem [#allocation11], %s2297_s20 }
  0xbe   : > { %1503 = vmatprep.subr.bf16.mxu1 %v1714_v0  ;;  %v1716_v2 = vld [vmem:[%s313_s2 + $0x10] sm:$0xff]   ;;  %v1718_v3 = vld [vmem:[%s2301_s30] sm:$0xff]   ;;  %v1717_v4 = vld [vmem:[%s313_s2 + $0x18] sm:$0xff]   ;;  %s1144_s4 = sshll.u32 %s356_s27, 4  ;;  %s1418_s8 = sshll.u32 %s2069_s25, 9  ;;  %s2347_s4 = int_to_ptr.vmem [resolvable:$true] %s1144_s4 }
  0xbf   : > { %1504 = vmatpush3.bf16.msra.mxu1 %v1714_v0  ;;  %1511 = vmatprep.mubr.msk.bf16.mxu1 %vm473_vm0, %v1718_v3  ;;  %v2325_v5 = vld [vmem:[%s2301_s30 + $0x8] sm:$0xff]   ;;  %v1722_v6 = vld [vmem:[#allocation7] sm:$0xff]   ;;  %v2328_v7 = vld [vmem:[%s2301_s30 + $0x10] sm:$0xff]   ;;  %s2354_s16 = scalar_lea.hbm %s2451_s5, %s1418_s8  ;;  %s1126_s9 = scalar_lea.sflag [#allocation4], %s2294_s14 }
  0xc0   : > { %1505 = vmatprep.subr.bf16.mxu1 %v1715_v1  ;;  %1551 = vmatprep.mubr.msk.bf16.mxu0 %vm473_vm0, %v1718_v3  ;;  %v1723_v8 = vld [vmem:[#allocation7 + $0x8] sm:$0xff]   ;;  %v1724_v9 = vld [vmem:[#allocation7 + $0x10] sm:$0xff]   ;;  %v2335_v10 = vld [vmem:[%s2301_s30 + $0x18] sm:$0xff]   ;;  %s1890_s17 = scalar_lea.vmem %s2347_s4, 512  ;;  %s2009_s3 = smov [#allocation11]  }
  0xc1   : > { %v1725_v11 = vld [vmem:[#allocation7 + $0x18] sm:$0xff]   ;;  %v1726_v12 = vld [vmem:[#allocation7 + $0x20] sm:$0xff]   ;;  %v1727_v13 = vld [vmem:[#allocation7 + $0x28] sm:$0xff]   ;;  %p1891_p2 = scmp.ne.s32.totalorder %s2347_s4, %s1890_s17  ;;  %s1894_s12 = sshll.u32 %s2009_s3, 4  ;;  %s1895_s12 = int_to_ptr.vmem [resolvable:$false] %s1894_s12 }
  0xc2   : > { %v1728_v14 = vld [vmem:[#allocation7 + $0x30] sm:$0xff]   ;;  %v1729_v15 = vld [vmem:[#allocation7 + $0x38] sm:$0xff]   ;;  %v1730_v48 = vld [vmem:[#allocation8] sm:$0xff]   ;;  %s1896_s26 = scalar_lea.vmem %s1895_s12, 1024  ;;  %p1897_p8 = scmp.lt.s32.totalorder %s2347_s4, %s1895_s12 }
  0xc3   : > { %1506 = vmatpush3.bf16.msra.mxu1 %v1715_v1  ;;  %v1731_v49 = vld [vmem:[#allocation8 + $0x8] sm:$0xff]   ;;  %v1732_v50 = vld [vmem:[#allocation8 + $0x10] sm:$0xff]   ;;  %v1733_v51 = vld [vmem:[#allocation8 + $0x18] sm:$0xff]   ;;  %p1892_p4 = pnand %p1891_p2, %p2202_p5  ;;  %p1898_p6 = scmp.lt.s32.totalorder %s1896_s26, %s1890_s17 }
  0xc4   : > { %1507 = vmatprep.subr.bf16.mxu1 %v1716_v2  ;;  %v1734_v52 = vld [vmem:[#allocation8 + $0x20] sm:$0xff]   ;;  %v1735_v53 = vld [vmem:[#allocation8 + $0x28] sm:$0xff]   ;;  %v1736_v54 = vld [vmem:[#allocation8 + $0x30] sm:$0xff]  }
  0xc5   : > { %v1737_v55 = vld [vmem:[#allocation8 + $0x38] sm:$0xff]   ;;  %v1738_v56 = vld [vmem:[#allocation10] sm:$0xff]   ;;  %v1739_v57 = vld [vmem:[#allocation10 + $0x8] sm:$0xff]   ;;  %p1893_p0 = pneg %p1892_p4  ;;  %p1899_p10 = por %p1898_p6, %p1897_p8 }
  0xc6   : > { %v1740_v58 = vld [vmem:[#allocation10 + $0x10] sm:$0xff]   ;;  %v1741_v59 = vld [vmem:[#allocation10 + $0x18] sm:$0xff]   ;;  %v1742_v60 = vld [vmem:[#allocation10 + $0x20] sm:$0xff]  }
  0xc7   : > { %1508 = vmatpush3.bf16.msra.mxu1 %v1716_v2  ;;  %v1743_v61 = vld [vmem:[#allocation10 + $0x28] sm:$0xff]   ;;  %v1744_v62 = vld [vmem:[#allocation10 + $0x30] sm:$0xff]   ;;  %p1900_p3 = pnand %p1899_p10, %p1893_p0 }
  0xc8   : > { %1509 = vmatprep.subr.bf16.mxu1 %v1717_v4 }
  0xcb   : > { %1510 = vmatpush3.bf16.msra.mxu1 %v1717_v4 }
  0xcc   : > { %1519 = vmatprep.subr.bf16.mxu1 %v1722_v6 }
  0xce   : > { %1512 = vmatmul.mubr.msk.bf16.vlgmr.msra.gmra.mrb[0].mxu1 %vm473_vm0, %v2325_v5 }
  0xcf   : > { %1515 = vmatprep.mubr.msk.bf16.mxu1 %vm473_vm0, %v2328_v7  ;;  %1520 = vmatpush3.bf16.msra.mxu1 %v1722_v6 }
  0xd0   : > { %1521 = vmatprep.subr.bf16.mxu1 %v1723_v8 }
  0xd3   : > { %1522 = vmatpush3.bf16.msra.mxu1 %v1723_v8 }
  0xd4   : > { %1523 = vmatprep.subr.bf16.mxu1 %v1724_v9 }
  0xd6   : > { %1516 = vmatmul.mubr.msk.bf16.gmra.mrb[4].mxu1 %vm473_vm0, %v2335_v10 }
  0xd7   : > { %1524 = vmatpush3.bf16.msra.mxu1 %v1724_v9 }
  0xd8   : > { %1525 = vmatprep.subr.bf16.mxu1 %v1725_v11 }
  0xdb   : > { %1526 = vmatpush3.bf16.msra.mxu1 %v1725_v11  ;;  %v1745_v11 = vld [vmem:[#allocation10 + $0x38] sm:$0xff]  }
  0xdc   : > { %1527 = vmatprep.subr.bf16.mxu1 %v1726_v12 }
  0xdf   : > { %1528 = vmatpush3.bf16.msra.mxu1 %v1726_v12 }
  0xe0   : > { %1529 = vmatprep.subr.bf16.mxu1 %v1727_v13 }
  0xe3   : > { %1530 = vmatpush3.bf16.msra.mxu1 %v1727_v13 }
  0xe4   : > { %1531 = vmatprep.subr.bf16.mxu1 %v1728_v14 }
  0xe7   : > { %1532 = vmatpush3.bf16.msra.mxu1 %v1728_v14 }
  0xe8   : > { %1533 = vmatprep.subr.bf16.mxu1 %v1729_v15 }
  0xeb   : > { %1534 = vmatpush3.bf16.msra.mxu1 %v1729_v15 }
  0xec   : > { %1583 = vmatprep.subr.bf16.mxu1 %v1738_v56 }
 0x1a1   : > { %v1513_v16 = vpop.f32.mrb[0].mxu1 }
 0x1a2   : > { %v520_v17 = vpop.f32.mrb[1].mxu1 }
 0x1a3   : > { %v1514_v18 = vpop.f32.mrb[2].mxu1 }
 0x1a4   : > { %v552_v19 = vpack.c.bf16 %v1514_v18, %v1513_v16  ;;  %v523_v20 = vpop.f32.mrb[3].mxu1 }
 0x1a5   : > { %v551_v21 = vpack.c.bf16 %v523_v20, %v520_v17 }
 0x1a7   : > { %1535 = vmatprep.mubr.bf16.mxu1 %v551_v21 }
 0x1a8   : > { %1536 = vmatmul.mubr.bf16.vlgmr.msra.gmra.mrb[8].mxu1 %v552_v19 }
 0x1a9   : > { %v1517_v22 = vpop.f32.mrb[4].mxu1  ;;  %1584 = vmatpush3.bf16.msra.mxu1 %v1738_v56 }
 0x1aa   : > { %v536_v23 = vpop.f32.mrb[5].mxu1  ;;  %1585 = vmatprep.subr.bf16.mxu1 %v1739_v57 }
 0x1ab   : > { %v1518_v24 = vpop.f32.mrb[6].mxu1 }
 0x1ac   : > { %v554_v25 = vpack.c.bf16 %v1518_v24, %v1517_v22  ;;  %v539_v26 = vpop.f32.mrb[7].mxu1 }
 0x1ad   : > { %v553_v27 = vpack.c.bf16 %v539_v26, %v536_v23  ;;  %1586 = vmatpush3.bf16.msra.mxu1 %v1739_v57 }
 0x1ae   : > { %1587 = vmatprep.subr.bf16.mxu1 %v1740_v58 }
 0x1af   : > { %1539 = vmatprep.mubr.bf16.mxu1 %v553_v27 }
 0x1b0   : > { %1540 = vmatmul.mubr.bf16.gmra.mrb[12].mxu1 %v554_v25 }
 0x1b1   : > { %1588 = vmatpush3.bf16.msra.mxu1 %v1740_v58 }
 0x1b2   : > { %1589 = vmatprep.subr.bf16.mxu1 %v1741_v59 }
 0x1b5   : > { %1590 = vmatpush3.bf16.msra.mxu1 %v1741_v59 }
 0x1b6   : > { %1591 = vmatprep.subr.bf16.mxu1 %v1742_v60 }
 0x1b9   : > { %1592 = vmatpush3.bf16.msra.mxu1 %v1742_v60 }
 0x1ba   : > { %1593 = vmatprep.subr.bf16.mxu1 %v1743_v61 }
 0x1bd   : > { %1594 = vmatpush3.bf16.msra.mxu1 %v1743_v61 }
 0x1be   : > { %1595 = vmatprep.subr.bf16.mxu1 %v1744_v62 }
 0x1c1   : > { %1596 = vmatpush3.bf16.msra.mxu1 %v1744_v62 }
 0x1c2   : > { %1597 = vmatprep.subr.bf16.mxu1 %v1745_v11 }
 0x1c5   : > { %1598 = vmatpush3.bf16.msra.mxu1 %v1745_v11 }
 0x27b   : > { %v1537_v28 = vpop.f32.mrb[8].mxu1 }
 0x27c   : > { %v637_v29 = vpop.f32.mrb[9].mxu1  ;;  %v670_v31 = vmax.f32 %v1537_v28, 0.0 }
 0x27d   : > { %v1538_v30 = vpop.f32.mrb[10].mxu1  ;;  %v668_v34 = vmax.f32 %v637_v29, 0.0 }
 0x27e   : > { %v671_v32 = vmax.f32 %v1538_v30, 0.0  ;;  %v640_v33 = vpop.f32.mrb[11].mxu1 }
 0x27f   : > { %v669_v35 = vmax.f32 %v640_v33, 0.0 }
 0x280   : > { %v677_v36 = vpack.c.bf16 %v671_v32, %v670_v31 }
 0x281   : > { %v676_v37 = vpack.c.bf16 %v669_v35, %v668_v34 }
 0x283   : > { %v1541_v38 = vpop.f32.mrb[12].mxu1  ;;  %1543 = vmatprep.subr.bf16.mxu0 %v676_v37 }
 0x284   : > { %v653_v39 = vpop.f32.mrb[13].mxu1  ;;  %1544 = vmatpush3.bf16.msra.mxu0 %v676_v37  ;;  %v674_v41 = vmax.f32 %v1541_v38, 0.0 }
 0x285   : > { %v1542_v40 = vpop.f32.mrb[14].mxu1  ;;  %1545 = vmatprep.subr.bf16.mxu0 %v677_v36  ;;  %v672_v44 = vmax.f32 %v653_v39, 0.0 }
 0x286   : > { %v675_v42 = vmax.f32 %v1542_v40, 0.0  ;;  %v656_v43 = vpop.f32.mrb[15].mxu1 }
 0x287   : > { %v673_v45 = vmax.f32 %v656_v43, 0.0 }
 0x288   : > { %v679_v46 = vpack.c.bf16 %v675_v42, %v674_v41  ;;  %1546 = vmatpush3.bf16.msra.mxu0 %v677_v36 }
 0x289   : > { %v678_v47 = vpack.c.bf16 %v673_v45, %v672_v44 }
 0x28b   : > { %1547 = vmatprep.subr.bf16.mxu0 %v678_v47 }
 0x28c   : > { %1548 = vmatpush3.bf16.msra.mxu0 %v678_v47 }
 0x28d   : > { %1549 = vmatprep.subr.bf16.mxu0 %v679_v46 }
 0x290   : > { %1550 = vmatpush3.bf16.msra.mxu0 %v679_v46 }
 0x291   : > { %1559 = vmatprep.subr.bf16.mxu0 %v1730_v48 }
 0x293   : > { %1552 = vmatmul.mubr.msk.bf16.vlgmr.msra.gmra.mrb[0].mxu0 %vm473_vm0, %v2325_v5 }
 0x294   : > { %1555 = vmatprep.mubr.msk.bf16.mxu0 %vm473_vm0, %v2328_v7  ;;  %1560 = vmatpush3.bf16.msra.mxu0 %v1730_v48 }
 0x295   : > { %1561 = vmatprep.subr.bf16.mxu0 %v1731_v49 }
 0x298   : > { %1562 = vmatpush3.bf16.msra.mxu0 %v1731_v49 }
 0x299   : > { %1563 = vmatprep.subr.bf16.mxu0 %v1732_v50 }
 0x29b   : > { %1556 = vmatmul.mubr.msk.bf16.gmra.mrb[4].mxu0 %vm473_vm0, %v2335_v10 }
 0x29c   : > { %1564 = vmatpush3.bf16.msra.mxu0 %v1732_v50 }
 0x29d   : > { %1565 = vmatprep.subr.bf16.mxu0 %v1733_v51 }
 0x2a0   : > { %1566 = vmatpush3.bf16.msra.mxu0 %v1733_v51 }
 0x2a1   : > { %1567 = vmatprep.subr.bf16.mxu0 %v1734_v52 }
 0x2a4   : > { %1568 = vmatpush3.bf16.msra.mxu0 %v1734_v52 }
 0x2a5   : > { %1569 = vmatprep.subr.bf16.mxu0 %v1735_v53 }
 0x2a8   : > { %1570 = vmatpush3.bf16.msra.mxu0 %v1735_v53 }
 0x2a9   : > { %1571 = vmatprep.subr.bf16.mxu0 %v1736_v54 }
 0x2ac   : > { %1572 = vmatpush3.bf16.msra.mxu0 %v1736_v54 }
 0x2ad   : > { %1573 = vmatprep.subr.bf16.mxu0 %v1737_v55 }
 0x2b0   : > { %1574 = vmatpush3.bf16.msra.mxu0 %v1737_v55 }
 0x366   : > { %v1553_v63 = vpop.f32.mrb[0].mxu0 }
 0x367   : > { %v714_v0 = vpop.f32.mrb[1].mxu0 }
 0x368   : > { %v1554_v1 = vpop.f32.mrb[2].mxu0 }
 0x369   : > { %v746_v2 = vpack.c.bf16 %v1554_v1, %v1553_v63  ;;  %v717_v3 = vpop.f32.mrb[3].mxu0 }
 0x36a   : > { %v745_v4 = vpack.c.bf16 %v717_v3, %v714_v0 }
 0x36c   : > { %1575 = vmatprep.mubr.bf16.mxu0 %v745_v4 }
 0x36d   : > { %1576 = vmatmul.mubr.bf16.vlgmr.msra.gmra.mrb[8].mxu0 %v746_v2 }
 0x36e   : > { %v1557_v5 = vpop.f32.mrb[4].mxu0 }
 0x36f   : > { %v730_v6 = vpop.f32.mrb[5].mxu0 }
 0x370   : > { %v1558_v7 = vpop.f32.mrb[6].mxu0 }
 0x371   : > { %v748_v8 = vpack.c.bf16 %v1558_v7, %v1557_v5  ;;  %v733_v9 = vpop.f32.mrb[7].mxu0 }
 0x372   : > { %v747_v10 = vpack.c.bf16 %v733_v9, %v730_v6 }
 0x374   : > { %1579 = vmatprep.mubr.bf16.mxu0 %v747_v10 }
 0x375   : > { %1580 = vmatmul.mubr.bf16.gmra.mrb[12].mxu0 %v748_v8 }
 0x440   : > { %v1577_v12 = vpop.f32.mrb[8].mxu0 }
 0x441   : > { %v831_v13 = vpop.f32.mrb[9].mxu0 }
 0x442   : > { %v1578_v14 = vpop.f32.mrb[10].mxu0 }
 0x443   : > { %v863_v15 = vpack.c.bf16 %v1578_v14, %v1577_v12  ;;  %v834_v16 = vpop.f32.mrb[11].mxu0 }
 0x444   : > { %v862_v17 = vpack.c.bf16 %v834_v16, %v831_v13 }
 0x446   : > { %1599 = vmatprep.mubr.bf16.mxu1 %v862_v17  ;;  %1607 = vmatprep.subr.bf16.mxu0 %v862_v17 }
 0x447   : > { %1615 = vmatprep.mubr.bf16.mxu0 %v862_v17  ;;  %1600 = vmatmul.mubr.bf16.vlgmr.msra.gmra.mrb[16].mxu1 %v863_v15 }
 0x448   : > { %1608 = vmatpush3.bf16.xpose.msra.mxu0 %v862_v17  ;;  %v1581_v18 = vpop.f32.mrb[12].mxu0 }
 0x449   : > { %1609 = vmatprep.subr.bf16.mxu0 %v863_v15  ;;  %v847_v19 = vpop.f32.mrb[13].mxu0 }
 0x44a   : > { %v1582_v20 = vpop.f32.mrb[14].mxu0 }
 0x44b   : > { %v865_v21 = vpack.c.bf16 %v1582_v20, %v1581_v18  ;;  %v850_v22 = vpop.f32.mrb[15].mxu0 }
 0x44c   : > { %v864_v23 = vpack.c.bf16 %v850_v22, %v847_v19 }
 0x44e   : > { %1603 = vmatprep.mubr.bf16.mxu1 %v864_v23 }
 0x44f   : > { %1604 = vmatmul.mubr.bf16.gmra.mrb[20].mxu1 %v865_v21 }
 0x450   : > { %1610 = vmatpush3.bf16.xpose.msra.mxu0 %v863_v15 }
 0x451   : > { %1611 = vmatprep.subr.bf16.mxu0 %v864_v23 }
 0x458   : > { %1612 = vmatpush3.bf16.xpose.msra.mxu0 %v864_v23 }
 0x459   : > { %1613 = vmatprep.subr.bf16.mxu0 %v865_v21 }
 0x460   : > { %1614 = vmatpush3.bf16.xpose.msra.mxu0 %v865_v21 }
 0x467   : > { %1616 = vmatmul.mubr.bf16.vlgmr.msra.gmra.mrb[16].mxu0 %v863_v15 }
 0x468   : > { %1619 = vmatprep.mubr.bf16.mxu0 %v864_v23 }
 0x46f   : > { %1620 = vmatmul.mubr.bf16.gmra.mrb[20].mxu0 %v865_v21 }
 0x51a   : > { %v1601_v24 = vpop.f32.mrb[16].mxu1 }
 0x51b   : > { %v948_v25 = vpop.f32.mrb[17].mxu1 }
 0x51c   : > { %v1602_v26 = vpop.f32.mrb[18].mxu1 }
 0x51d   : > { %v1428_v27 = vpack.c.bf16 %v1602_v26, %v1601_v24  ;;  %v951_v28 = vpop.f32.mrb[19].mxu1 }
 0x51e   : > { %v1423_v29 = vpack.c.bf16 %v951_v28, %v948_v25 }
 0x51f   : > { %1440 = vst [vmem:[%s356_s27 + $0x8] sm:$0xff] %v1428_v27  }
 0x520   : > { %1424 = vst [vmem:[%s356_s27] sm:$0xff] %v1423_v29  }
 0x522   : > { %v1605_v30 = vpop.f32.mrb[20].mxu1 }
 0x523   : > { %v964_v31 = vpop.f32.mrb[21].mxu1 }
 0x524   : > { %v1606_v32 = vpop.f32.mrb[22].mxu1 }
 0x525   : > { %v1438_v33 = vpack.c.bf16 %v1606_v32, %v1605_v30  ;;  %v967_v34 = vpop.f32.mrb[23].mxu1 }
 0x526   : > { %v1433_v35 = vpack.c.bf16 %v967_v34, %v964_v31 }
 0x527   : > { %1442 = vst [vmem:[%s356_s27 + $0x18] sm:$0xff] %v1438_v33  }
 0x528   : > { %1441 = vst [vmem:[%s356_s27 + $0x10] sm:$0xff] %v1433_v35  }
 0x529   : > { %1903 = shalt.err (!%p1900_p3)
}
 0x52a   : > { %s1904_s10 = scalar_lea.hbm %s2354_s16, 512  ;;  %s1908_s30 = scalar_lea.hbm %s2451_s5, 1024 }
 0x52b   : > { %p1905_p9 = scmp.ne.s32.totalorder %s2354_s16, %s1904_s10  ;;  %p1909_p7 = scmp.lt.u32.totalorder %s2354_s16, %s2451_s5 }
 0x52c   : > { %p1910_p12 = scmp.lt.u32.totalorder %s1908_s30, %s1904_s10  ;;  %p1912_p2 = scmp.lt.u32.totalorder %s1904_s10, %s2354_s16 }
 0x52d   : > { %p1906_p13 = pnand %p1905_p9, %p2202_p5 }
 0x52e   : > { %p1911_p1 = por %p1910_p12, %p1909_p7 }
 0x52f   : > { %p1907_p11 = pneg %p1906_p13 }
 0x530   : > { %p1913_p4 = por %p1912_p2, %p1911_p1 }
 0x532   : > { %p1914_p0 = pnand %p1913_p4, %p1907_p11 }
 0x534   : > { %1917 = shalt.err (!%p1914_p0)
}
 0x535   : > { %s2010_s2 = smov 64   ;;  %s2011_s27 = smov 4   ;;  %vm1116_vm1 = vcmask 519168  }
 0x536   : > { %1639 = dma.vmem_to_hbm [thread:$0]  (%p2202_p5), %s2347_s4, 512, %s2354_s16, %s1126_s9, %s2010_s2, %s2010_s2, %s2011_s27  }
 0x537   : > { %s363_s13 = scalar_lea.vmem [#allocation12], %s2297_s20  ;;  %s2394_s16 = scalar_lea.hbm %s2452_s6, %s1418_s8 }
 0x538   : > { %s1160_s4 = sshll.u32 %s363_s13, 4  ;;  %s1131_s9 = scalar_lea.sflag [#allocation13], %s2294_s14  ;;  %s2397_s4 = int_to_ptr.vmem [resolvable:$true] %s1160_s4 }
 0x539   : > { %s1918_s17 = scalar_lea.vmem %s2397_s4, 512  ;;  %s2012_s25 = smov [#allocation12]  }
 0x53a   : > { %v1617_v36 = vpop.f32.mrb[16].mxu0  ;;  %p1919_p8 = scmp.ne.s32.totalorder %s2397_s4, %s1918_s17  ;;  %s1922_s8 = sshll.u32 %s2012_s25, 4  ;;  %s1923_s8 = int_to_ptr.vmem [resolvable:$false] %s1922_s8 }
 0x53b   : > { %v1412_v37 = vpack.c.bf16 %v1617_v36, %v1617_v36  ;;  %v1053_v38 = vpop.f32.mrb[17].mxu0  ;;  %s1924_s3 = scalar_lea.vmem %s1923_s8, 1024  ;;  %p1925_p3 = scmp.lt.s32.totalorder %s2397_s4, %s1923_s8 }
 0x53c   : > { %v1410_v39 = vpack.c.bf16 %v1053_v38, %v1053_v38  ;;  %v1618_v40 = vpop.f32.mrb[18].mxu0  ;;  %p1920_p6 = pnand %p1919_p8, %p2202_p5  ;;  %p1926_p9 = scmp.lt.s32.totalorder %s1924_s3, %s1918_s17 }
 0x53d   : > { %1119 = vst.msk [vmem:[%s363_s13 + $0x8] sm:$0xf] %vm1116_vm1, %v1412_v37  ;;  %v1413_v41 = vpack.c.bf16 %v1618_v40, %v1618_v40  ;;  %v1056_v42 = vpop.f32.mrb[19].mxu0 }
 0x53e   : > { %1117 = vst.msk [vmem:[%s363_s13] sm:$0xf] %vm1116_vm1, %v1410_v39  ;;  %v1411_v43 = vpack.c.bf16 %v1056_v42, %v1056_v42  ;;  %p1921_p10 = pneg %p1920_p6  ;;  %p1927_p13 = por %p1926_p9, %p1925_p3 }
 0x53f   : > { %1120 = vst.msk [vmem:[%s363_s13 + $0xc] sm:$0xf] %vm1116_vm1, %v1413_v41 }
 0x540   : > { %1118 = vst.msk [vmem:[%s363_s13 + $0x4] sm:$0xf] %vm1116_vm1, %v1411_v43  ;;  %p1928_p11 = pnand %p1927_p13, %p1921_p10 }
 0x542   : > { %v1621_v44 = vpop.f32.mrb[20].mxu0 }
 0x543   : > { %v1416_v45 = vpack.c.bf16 %v1621_v44, %v1621_v44  ;;  %v1069_v46 = vpop.f32.mrb[21].mxu0 }
 0x544   : > { %v1414_v47 = vpack.c.bf16 %v1069_v46, %v1069_v46  ;;  %v1622_v48 = vpop.f32.mrb[22].mxu0 }
 0x545   : > { %1123 = vst.msk [vmem:[%s363_s13 + $0x18] sm:$0xf] %vm1116_vm1, %v1416_v45  ;;  %v1417_v49 = vpack.c.bf16 %v1622_v48, %v1622_v48  ;;  %v1072_v50 = vpop.f32.mrb[23].mxu0 }
 0x546   : > { %1121 = vst.msk [vmem:[%s363_s13 + $0x10] sm:$0xf] %vm1116_vm1, %v1414_v47  ;;  %v1415_v51 = vpack.c.bf16 %v1072_v50, %v1072_v50 }
 0x547   : > { %1124 = vst.msk [vmem:[%s363_s13 + $0x1c] sm:$0xf] %vm1116_vm1, %v1417_v49 }
 0x548   : > { %1122 = vst.msk [vmem:[%s363_s13 + $0x14] sm:$0xf] %vm1116_vm1, %v1415_v51 }
 0x549   : > { %1931 = shalt.err (!%p1928_p11)
}
 0x54a   : > { %s1932_s12 = scalar_lea.hbm %s2394_s16, 512  ;;  %s1936_s0 = scalar_lea.hbm %s2452_s6, 1024 }
 0x54b   : > { %p1933_p7 = scmp.ne.s32.totalorder %s2394_s16, %s1932_s12  ;;  %p1937_p2 = scmp.lt.u32.totalorder %s2394_s16, %s2452_s6 }
 0x54c   : > { %p1938_p4 = scmp.lt.u32.totalorder %s1936_s0, %s1932_s12  ;;  %p1940_p8 = scmp.lt.u32.totalorder %s1932_s12, %s2394_s16 }
 0x54d   : > { %p1934_p12 = pnand %p1933_p7, %p2202_p5 }
 0x54e   : > { %p1939_p0 = por %p1938_p4, %p1937_p2 }
 0x54f   : > { %p1935_p1 = pneg %p1934_p12 }
 0x550   : > { %p1941_p6 = por %p1940_p8, %p1939_p0 }
 0x552   : > { %p1942_p10 = pnand %p1941_p6, %p1935_p1 }
 0x554   : > { %1945 = shalt.err (!%p1942_p10)
}
 0x555   : > { %1640 = dma.vmem_to_hbm [thread:$0]  (%p2202_p5), %s2397_s4, 512, %s2394_s16, %s1131_s9, %s2010_s2, %s2010_s2, %s2011_s27  }
 0x556 PF: > { %s1175_s29 = sand.u32 1, %s1988_s21   ;;  %p2485_p3 = scmp.ne.s32.totalorder %s2465_s28, 0 }
 0x557   : > { %p2486_p9 = scmp.ge.s32.totalorder %s2000_s24, 2  ;;  %s1176_s19 = scalar_lea.sflag [#allocation4], %s1175_s29 }
 0x559   : > { %p1661_p13 = pnand %p2486_p9, %p2485_p3 }
 0x55b   : > { %1979 = dma.done.wait (!%p1661_p13), %s1176_s19, 512  }
 0x55c   : > { %1981 = vsyncadd (!%p1661_p13), %s1176_s19, 4294966784  ;;  %s1185_s15 = scalar_lea.sflag [#allocation13], %s1175_s29 }
 0x55d   : > { %1983 = dma.done.wait (!%p1661_p13), %s1185_s15, 512  }
 0x55e   : > { %1985 = vsyncadd (!%p1661_p13), %s1185_s15, 4294966784  ;;  %s2487_s14 = sld [smem:[#allocation20_spill]]  ;;  %p27_p5 = scmp.ge.s32.totalorder %s2188_s18, 4  }
 0x55f   : > { %s2488_s21 = smov %s1992_s22  ;;  %s2489_s22 = smov %s1996_s23 }
 0x560   : > { %s2491_s24 = smov %s2188_s18  ;;  %29 = sbr.rel (!%p27_p5) target bundleno = 15 (0xf), region = 127 }
 0x564   : > { %s2490_s23 = smov %s2487_s14 }
 0x567   :  { %1190 = vsyncpa [#allocation3], 1 }
 0x568   :  { %1192 = vsyncpa [#allocation3 + $0x1], 1 }
 0x569   :  { %1193 = vsyncpa [#allocation6], 1 }
 0x56a   :  { %1195 = vsyncpa [#allocation6 + $0x1], 1 }
 0x56b   :  { %1196 = vsyncpa [#allocation9], 1 }
 0x56c   :  { %1197 = vsyncpa [#allocation4], 1 }
 0x56d   :  { %1199 = vsyncpa [#allocation4 + $0x1], 1 }
 0x56e   :  { %1200 = vsyncpa [#allocation13], 1 }
 0x56f   :  { %1202 = vsyncpa [#allocation13 + $0x1], 1 }

</bundles_post_ra>
